<compile_context>
chip_gen: v7x
topology: tpu7x:2x2x1
jax: 0.10.0
libtpu: 0.0.40
codegen_flags: <defaults>
</compile_context>

<pallas_src>
import jax
import jax.numpy as jnp
from jax.experimental import pallas as pl
from jax.experimental.pallas import tpu as pltpu


def _sse_kernel(x_ref, w_ref, b_ref, o_ref):
    # x_ref: (1, C, T) tile of x viewed as (B, C, H*W); T (pixels) = lane axis.
    # w_ref: (1, C) conv weight in VMEM (x dtype); b_ref: (1, 1) f32 bias in SMEM.
    x = x_ref[0]                                               # (C, T)
    precision = (jax.lax.Precision.HIGHEST
                 if x.dtype == jnp.float32 else jax.lax.Precision.DEFAULT)
    # 1x1 conv == per-pixel dot over channels -> single MXU matmul, f32 acc.
    s = jnp.dot(w_ref[...], x,
                preferred_element_type=jnp.float32,
                precision=precision)                           # (1, T) f32
    attn = jax.nn.sigmoid(s + b_ref[0, 0])                     # (1, T) f32 (EUP)
    # Gate in f32, single downcast; the (1,T) row broadcasts over the C rows.
    o_ref[0] = (x.astype(jnp.float32) * attn).astype(o_ref.dtype)


def _round_up(n, m):
    return ((n + m - 1) // m) * m


def _cdiv(a, b):
    return (a + b - 1) // b


def sse_forward(x_nchw, weight, bias, *, tile_px=None):
    """x_nchw: (B, C, H, W); weight: (C,) 1x1-conv weight; bias: () scalar."""
    B, C, H, W = x_nchw.shape
    n_px = H * W
    dtype = x_nchw.dtype
    itemsize = jnp.dtype(dtype).itemsize
    x_r = x_nchw.reshape(B, C, n_px)          # free view: H*W already contiguous

    if tile_px is None:
        # Size tiles by their *padded* VMEM footprint (C < 8 sublanes pads up).
        sublane_pack = 8 * max(1, 4 // itemsize)      # 8 f32, 16 bf16, 32 int8
        padded_c = _round_up(C, sublane_pack)
        target_bytes = 4 << 20                         # ~4 MiB per x tile
        tile_px = max(128, (target_bytes // (padded_c * itemsize)) // 128 * 128)
        tile_px = min(tile_px, _round_up(n_px, 128))
        # v7x megacore: keep enough grid steps for 2 TCs + pipeline depth.
        while B * _cdiv(n_px, tile_px) < 8 and tile_px > 512:
            tile_px = max(512, _round_up(tile_px // 2, 128))

    grid = (B, _cdiv(n_px, tile_px))          # ragged last block masked by Pallas

    w_row = weight.reshape(1, C).astype(dtype)      # MXU takes x's dtype natively
    b2d = jnp.asarray(bias, jnp.float32).reshape(1, 1)

    out_r = pl.pallas_call(
        _sse_kernel,
        out_shape=jax.ShapeDtypeStruct((B, C, n_px), dtype),
        grid_spec=pltpu.PrefetchScalarGridSpec(
            num_scalar_prefetch=0,
            grid=grid,
            in_specs=[
                pl.BlockSpec((1, C, tile_px), lambda b, j: (b, 0, j)),   # x tile
                pl.BlockSpec((1, C), lambda b, j: (0, 0)),               # conv weight
                pl.BlockSpec((1, 1), lambda b, j: (0, 0),
                             memory_space=pltpu.MemorySpace.SMEM),       # conv bias
            ],
            out_specs=pl.BlockSpec((1, C, tile_px), lambda b, j: (b, 0, j)),
        ),
        compiler_params=pltpu.CompilerParams(
            dimension_semantics=("parallel", "parallel"),
            vmem_limit_bytes=40 * 1024 * 1024),
    )(x_r, w_row, b2d)

    return out_r.reshape(B, C, H, W)


def _reference(x_f32, w_f32, bias):
    # Pure-JAX f32 reference (VPU multiply+sum: no matmul-precision ambiguity).
    s = jnp.sum(x_f32 * w_f32[None, :, None, None], axis=1) + bias
    return x_f32 * jax.nn.sigmoid(s)[:, None, :, :]


if __name__ == "__main__":
    key = jax.random.PRNGKey(0)

    def run_case(case_id, B, C, H, W, dtype, atol, rtol):
        kx, kw, kb = jax.random.split(jax.random.fold_in(key, case_id), 3)
        x = jax.random.normal(kx, (B, C, H, W), jnp.float32).astype(dtype)
        weight = jax.random.normal(kw, (C,), jnp.float32) * 0.5
        bias = jax.random.normal(kb, (), jnp.float32) * 0.1

        out = jax.block_until_ready(sse_forward(x, weight, bias))
        assert out.shape == (B, C, H, W) and out.dtype == dtype

        # Reference sees the same (dtype-rounded) inputs the kernel uses.
        ref = _reference(x.astype(jnp.float32),
                         weight.astype(dtype).astype(jnp.float32), bias)
        assert jnp.allclose(out.astype(jnp.float32), ref, atol=atol, rtol=rtol), \
            f"mismatch vs reference (case {case_id}: B={B} C={C} H={H} W={W} {dtype})"

    run_case(0, 2, 4, 16, 16, jnp.float32, 1e-4, 1e-4)   # main shape, single tile
    run_case(1, 2, 16, 7, 7, jnp.float32, 1e-4, 1e-4)    # ragged pixel block, C > 8
    run_case(2, 1, 8, 12, 12, jnp.bfloat16, 3e-2, 3e-2)  # bf16 path, ragged block
    print("KERNEL_OK")
</pallas_src>

<mosaic_0001>
module attributes {stable_mosaic.version = 11 : i64} {
  func.func @_sse_kernel(%arg0: i32, %arg1: i32, %arg2: memref<1x4x256xf32, #tpu.memory_space<vmem>>, %arg3: memref<1x4xf32, #tpu.memory_space<vmem>>, %arg4: memref<1x1xf32, #tpu.memory_space<smem>>, %arg5: memref<1x4x256xf32, #tpu.memory_space<vmem>>) attributes {dimension_semantics = [#tpu.dimension_semantics<parallel>, #tpu.dimension_semantics<parallel>], iteration_bounds = array<i64: 2, 1>, scalar_prefetch = 0 : i64, scratch_operands = 0 : i64, tpu.core_type = #tpu.core_type<tc>, window_params = [{transform_indices = @transform_0, window_bounds = array<i64: 1, 4, 256>}, {pipeline_mode = #tpu.pipeline_mode<synchronous>, transform_indices = @transform_1, window_bounds = array<i64: 1, 4>}, {transform_indices = @transform_2, window_bounds = array<i64: 1, 1>}, {transform_indices = @transform_3, window_bounds = array<i64: 1, 4, 256>}]} {
    %c0 = arith.constant 0 : index
    %c0_0 = arith.constant 0 : index
    %c0_1 = arith.constant 0 : index
    %0 = vector.load %arg2[%c0, %c0_0, %c0_1] : memref<1x4x256xf32, #tpu.memory_space<vmem>>, vector<1x4x256xf32>
    %1 = vector.shape_cast %0 : vector<1x4x256xf32> to vector<4x256xf32>
    %c0_2 = arith.constant 0 : index
    %c0_3 = arith.constant 0 : index
    %2 = vector.load %arg3[%c0_2, %c0_3] : memref<1x4xf32, #tpu.memory_space<vmem>>, vector<1x4xf32>
    %cst = arith.constant dense<0.000000e+00> : vector<1x256xf32>
    %3 = tpu.matmul %2, %1, %cst {dimension_numbers = #tpu.dot_dimension_numbers<[1], [0], [0], [1], [0, 0, 1, 1], [], []>, precision = #tpu.contract_precision<fp32>} : vector<1x4xf32>, vector<4x256xf32>, vector<1x256xf32> -> vector<1x256xf32>
    %c0_4 = arith.constant 0 : index
    %c0_5 = arith.constant 0 : index
    %4 = memref.load %arg4[%c0_4, %c0_5] : memref<1x1xf32, #tpu.memory_space<smem>>
    %5 = vector.broadcast %4 : f32 to vector<1x256xf32>
    %6 = arith.addf %3, %5 : vector<1x256xf32>
    %7 = arith.negf %6 : vector<1x256xf32>
    %8 = math.exp %7 : vector<1x256xf32>
    %cst_6 = arith.constant 1.000000e+00 : f32
    %9 = vector.broadcast %cst_6 : f32 to vector<1x256xf32>
    %10 = arith.addf %9, %8 : vector<1x256xf32>
    %11 = arith.divf %9, %10 : vector<1x256xf32>
    %12 = vector.broadcast %11 : vector<1x256xf32> to vector<4x256xf32>
    %13 = arith.mulf %1, %12 : vector<4x256xf32>
    %c0_7 = arith.constant 0 : index
    %c0_8 = arith.constant 0 : index
    %c0_9 = arith.constant 0 : index
    %14 = vector.load %arg5[%c0_7, %c0_8, %c0_9] : memref<1x4x256xf32, #tpu.memory_space<vmem>>, vector<1x4x256xf32>
    %15 = vector.shape_cast %14 : vector<1x4x256xf32> to vector<4x256xf32>
    %16 = vector.shape_cast %13 : vector<4x256xf32> to vector<1x4x256xf32>
    tpu.vector_store %arg5[%c0_7, %c0_8, %c0_9], %16 {strides = array<i32>} : memref<1x4x256xf32, #tpu.memory_space<vmem>>, vector<1x4x256xf32>,
    return
  }
  func.func @transform_0(%arg0: i32, %arg1: i32) -> (i32, i32, i32) {
    %c0_i32 = arith.constant 0 : i32
    %c0_i32_0 = arith.constant 0 : i32
    return %arg0, %c0_i32, %arg1 : i32, i32, i32
  }
  func.func @transform_1(%arg0: i32, %arg1: i32) -> (i32, i32) {
    %c0_i32 = arith.constant 0 : i32
    %c0_i32_0 = arith.constant 0 : i32
    %c0_i32_1 = arith.constant 0 : i32
    return %c0_i32, %c0_i32_0 : i32, i32
  }
  func.func @transform_2(%arg0: i32, %arg1: i32) -> (i32, i32) {
    %c0_i32 = arith.constant 0 : i32
    %c0_i32_0 = arith.constant 0 : i32
    %c0_i32_1 = arith.constant 0 : i32
    return %c0_i32, %c0_i32_0 : i32, i32
  }
  func.func @transform_3(%arg0: i32, %arg1: i32) -> (i32, i32, i32) {
    %c0_i32 = arith.constant 0 : i32
    %c0_i32_0 = arith.constant 0 : i32
    return %arg0, %c0_i32, %arg1 : i32, i32, i32
  }
}

</mosaic_0001>

<bundles_post_ra>
// kernel: tpu_custom_call.1
= control target key start
LH: loop header
LB: loop body
LE: loop exit
PB: predicated region body
PF: predicated region fallthrough
CT: control target
= control target key end

     0   :  { %s1243_s0 = inlined_call_operand.hbm [shape: f32[2,4,256], index: 0, kind: input, shape index: {}]   ;;  %s1244_s1 = inlined_call_operand.vmem [shape: f32[1,4], index: 1, kind: input, shape index: {}]   ;;  %s1245_s2 = inlined_call_operand.<no memory space> [shape: f32[1,1], index: 2, kind: input, shape index: {}]   ;;  %s1246_s3 = inlined_call_operand.hbm [shape: f32[2,4,256], index: 3, kind: output, shape index: {}]  }
   0x1   :  { %8 = sst [smem:[#allocation2]] %s1245_s2 }
   0x2   :  { %9 = vsyncpa [#allocation4], 0 }
   0x3   :  { %11 = vsyncpa [#allocation4 + $0x1], 0 }
   0x4   :  { %12 = vsyncpa [#allocation5], 0 }
   0x5   :  { %14 = vsyncpa [#allocation5 + $0x1], 0  ;;  %s1058_s14 = smov 0   ;;  %s1060_s15 = smov 0  }
   0x6   :  { %s1062_s16 = smov 0   ;;  %s1064_s17 = smov 0  }
   0x7   :  { %s1066_s18 = smov 0   ;;  %s1068_s19 = smov 0  }
   0x8 LB: > { %s815_s2 = sadd.s32 4294967295, %s1030_s19   ;;  %s816_s20 = sadd.s32 4294967294, %s1030_s19   ;;  %s1030_s19 = sphi %s1068_s19, %s20_s19   ;;  %s1026_s18 = sphi %s1066_s18, %s1262_s18   ;;  %s1022_s17 = sphi %s1064_s17, %s1261_s17   ;;  %s1018_s16 = sphi %s1062_s16, %s1260_s16   ;;  %s1014_s15 = sphi %s1060_s15, %s1259_s15   ;;  %s1010_s14 = sphi %s1058_s14, %s1258_s14  }
   0x9   : > { %s32_s21 = sadd.s32 1, %s1026_s18  ;;  %s41_s22 = sadd.s32 1, %s1018_s16 }
   0xa   : > { %p34_p0 = scmp.ge.s32.totalorder %s32_s21, 2  ;;  %p48_p1 = scmp.ne.s32.totalorder %s1018_s16, %s1014_s15 }
   0xb   : > { %p49_p2 = scmp.eq.s32.totalorder %s1030_s19, 0  ;;  %p54_p3 = scmp.ne.s32.totalorder %s1014_s15, %s1010_s14 }
   0xc   : > { %s1264_s21 = smov (%p34_p0, %s32_s21), 0  ;;  %p55_p5 = scmp.eq.s32.totalorder %s815_s2, 0 }
   0xd   : > { %p1099_p4 = por %p49_p2, %p48_p1  ;;  %s36_s24 = ssub.s32 %s1026_s18, %s1264_s21 }
   0xe   : > { %p122_p6 = scmp.eq.s32.totalorder %s815_s2, 1  ;;  %p39_p7 = scmp.eq.s32.totalorder %s36_s24, 0 }
   0xf   : > { %p1105_p8 = por %p55_p5, %p54_p3  ;;  %p128_p10 = scmp.eq.s32.totalorder %s816_s20, 1 }
  0x10   : > { %p1109_p9 = por %p122_p6, %p48_p1  ;;  %p858_p13 = scmp.lt.s32.totalorder %s1030_s19, 2 }
  0x11   : > { %s1114_s27 = scalar_select %p39_p7, %s1018_s16, %s41_s22  }
  0x12   : > { %s1250_s26 = scalar_select %p1109_p9, 1, 0 }
  0x13   : > { %p1116_p11 = por %p128_p10, %p54_p3  ;;  %s154_s29 = sand.u32 1, %s1018_s16  }
  0x14   : > { %s819_s30 = sshll.u32 %s154_s29, 3  ;;  %s832_s4 = sshll.u32 %s1026_s18, 7 }
  0x15   : > { %s1251_s28 = scalar_select %p1116_p11, 1, 0 }
  0x16   : > { %s1127_s7 = scalar_lea.hbm %s1243_s0, %s832_s4  ;;  %s158_s8 = scalar_lea.vmem [#allocation3], %s819_s30 }
  0x17   : > { %s168_s9 = sshll.u32 %s158_s8, 4  ;;  %p1133_p0 = pnand %p858_p13, %p1099_p4  ;;  %s1129_s9 = int_to_ptr.vmem [resolvable:$true] %s168_s9 }
  0x18   : > { %s155_s11 = scalar_lea.sflag [#allocation4], %s154_s29  ;;  %s918_s12 = scalar_lea.hbm %s1127_s7, 128 }
  0x19   : > { %p919_p3 = scmp.ne.s32.totalorder %s1127_s7, %s918_s12  ;;  %p920_p5 = pneg %p1133_p0 }
  0x1a   : > { %s923_s20 = scalar_lea.hbm %s1243_s0, 256  ;;  %p924_p4 = scmp.lt.u32.totalorder %s1127_s7, %s1243_s0 }
  0x1b   : > { %p921_p6 = pnand %p920_p5, %p919_p3  ;;  %p925_p10 = scmp.lt.u32.totalorder %s923_s20, %s918_s12 }
  0x1c   : > { %p927_p12 = scmp.lt.u32.totalorder %s918_s12, %s1127_s7 }
  0x1d   : > { %p922_p7 = pneg %p921_p6  ;;  %p926_p13 = por %p925_p10, %p924_p4 }
  0x1f   : > { %p928_p1 = por %p927_p12, %p926_p13 }
  0x21   : > { %p929_p2 = pnand %p928_p1, %p922_p7 }
  0x23   : > { %932 = shalt.err (!%p929_p2)
}
  0x24   : > { %s933_s24 = scalar_lea.vmem %s1129_s9, 128  ;;  %s1032_s29 = smov [#allocation3]  }
  0x25   : > { %p934_p3 = scmp.ne.s32.totalorder %s1129_s9, %s933_s24  ;;  %s938_s30 = sshll.u32 %s1032_s29, 4  ;;  %s939_s30 = int_to_ptr.vmem [resolvable:$false] %s938_s30 }
  0x26   : > { %s940_s4 = scalar_lea.vmem %s939_s30, 256  ;;  %p941_p9 = scmp.lt.s32.totalorder %s1129_s9, %s939_s30 }
  0x27   : > { %p936_p6 = pnand %p934_p3, %p920_p5  ;;  %p942_p4 = scmp.lt.s32.totalorder %s940_s4, %s933_s24 }
  0x29   : > { %p937_p11 = pneg %p936_p6  ;;  %p943_p10 = por %p942_p4, %p941_p9 }
  0x2b   : > { %p944_p12 = pnand %p943_p10, %p937_p11 }
  0x2d   : > { %947 = shalt.err (!%p944_p12)
}
  0x2e   : > { %853 = dma.hbm_to_vmem [thread:$0]  (!%p1133_p0), %s1127_s7, 128, %s1129_s9, %s155_s11  }
  0x2f   : > { %p1253_p1 = scmp.lt.s32.totalorder %s1030_s19, 3  ;;  %p1254_p2 = scmp.ge.s32.totalorder %s1030_s19, 1 }
  0x31   : > { %p174_p5 = pnand %p1254_p2, %p1253_p1 }
  0x32   : > { %s1169_s5 = sand.u32 (!%p174_p5), 1, %s1014_s15  }
  0x33   : > { %177 = sbr.rel (%p174_p5) target bundleno = 351 (0x15f), region = 32  ;;  %s823_s6 = sshll.u32 (!%p174_p5), %s1169_s5, 3 }
  0x34   : > { %s180_s8 = scalar_lea.sflag (!%p174_p5), [#allocation4], %s1169_s5  ;;  %s183_s10 = scalar_lea.vmem (!%p174_p5), [#allocation3], %s823_s6 }
  0x3a   : > { %1001 = dma.done.wait (%p1105_p8), %s180_s8, 128  }
  0x3b   : > { %1003 = vsyncadd (%p1105_p8), %s180_s8, 4294967168  ;;  %v1033_v0 = vmov 0.0   ;;  %vm218_vm0 = vcmask 1043456   ;;  %vm214_vm1 = vcmask 31744   ;;  %v1179_v1 = vld [vmem:[%s183_s10] sm:$0xff]  ;;  %s210_s25 = sld [smem:[#allocation2]]  ;;  %v700_v37 = vlaneseq }
  0x3c   : > { %526 = vmatprep.mubr.f32.mxu0 %v1033_v0  ;;  %289 = vmatprep.mubr.f32.mxu1 %v1033_v0  ;;  %v209_v2 = vld [vmem:[%s1244_s1] sm:$0x1]  ;;  %v213_v3 = vcombine.high %v1179_v1, %v1179_v1  ;;  %v219_v4 = vsel %vm218_vm0, %v1179_v1, 0  ;;  %s833_s11 = sshll.u32 %s1022_s17, 7  ;;  %s205_s12 = scalar_lea.vmem [#allocation6], %s823_s6 }
  0x3d   : > { %v216_v5 = vsel %vm214_vm1, %v209_v2, 0  ;;  %v225_v6 = vand.u32 4294901760, %v219_v4  ;;  %v701_v38 = vshrl.u32 %v700_v37, 7  ;;  %s731_s13 = sshll.u32 %s205_s12, 4  ;;  %s1194_s22 = scalar_lea.hbm %s1246_s3, %s833_s11  ;;  %s1196_s13 = int_to_ptr.vmem [resolvable:$true] %s731_s13 }
  0x3e   : > { %v290_v7 = vand.u32 4294901760, %v216_v5  ;;  %v221_v8 = vsel %vm218_vm0, %v213_v3, 0  ;;  %s715_s23 = scalar_lea.sflag [#allocation5], %s1169_s5  ;;  %s948_s24 = scalar_lea.vmem %s1196_s13, 128 }
  0x3f   : > { %v223_v9 = vand.u32 4294901760, %v221_v8  ;;  %v308_v10 = vsub.f32 %v219_v4, %v225_v6  ;;  %v702_v39 = vsub.s32 0, %v701_v38  ;;  %p949_p8 = scmp.ne.s32.totalorder %s1196_s13, %s948_s24  ;;  %p1255_p9 = scmp.ne.s32.totalorder %s1250_s26, 0 }
  0x40   : > { %v291_v11 = vsub.f32 %v216_v5, %v290_v7  ;;  %s1034_s17 = smov [#allocation6]  }
  0x41   : > { %461 = vmatprep.subr.mxu0 %v223_v9  ;;  %224 = vmatprep.subr.mxu1 %v223_v9  ;;  %v302_v13 = vsub.f32 %v221_v8, %v223_v9  ;;  %v309_v14 = vand.u32 4294901760, %v308_v10  ;;  %v211_v24 = vstv %s210_s25  ;;  %p950_p11 = pnand %p949_p8, %p1255_p9  ;;  %s952_s29 = sshll.u32 %s1034_s17, 4  ;;  %s953_s29 = int_to_ptr.vmem [resolvable:$false] %s952_s29 }
  0x42   : > { %v292_v12 = vand.u32 4294901760, %v291_v11  ;;  %463 = vmatpush1.msra.mxu0 %v225_v6  ;;  %226 = vmatpush1.msra.mxu1 %v225_v6  ;;  %s954_s30 = scalar_lea.vmem %s953_s29, 256  ;;  %p955_p7 = scmp.lt.s32.totalorder %s1196_s13, %s953_s29 }
  0x43   : > { %v303_v16 = vand.u32 4294901760, %v302_v13  ;;  %v310_v17 = vsub.f32 %v308_v10, %v309_v14  ;;  %p951_p0 = pneg %p950_p11  ;;  %p956_p13 = scmp.lt.s32.totalorder %s954_s30, %s948_s24 }
  0x44   : > { %530 = vmatmul.mubr.f32.vlgmr.msra.gmra.mrb[0].mxu0 %v292_v12  ;;  %v293_v15 = vsub.f32 %v291_v11, %v292_v12 }
  0x45   : > { %606 = vmatprep.mubr.f32.mxu0 %v1033_v0  ;;  %v304_v19 = vsub.f32 %v302_v13, %v303_v16  ;;  %539 = vmatprep.subr.mxu0 %v303_v16  ;;  %v311_v20 = vand.u32 4294901760, %v310_v17  ;;  %p957_p3 = por %p956_p13, %p955_p7 }
  0x46   : > { %v294_v18 = vand.u32 4294901760, %v293_v15  ;;  %543 = vmatpush1.msra.mxu0 %v309_v14 }
  0x47   : > { %v305_v21 = vand.u32 4294901760, %v304_v19  ;;  %615 = vmatprep.subr.mxu0 %v223_v9  ;;  %p958_p6 = pnand %p957_p3, %p951_p0 }
  0x48   : > { %295 = vmatmul.mubr.f32.vlgmr.msra.gmra.mrb[0].mxu1 %v294_v18 }
  0x49   : > { %375 = vmatprep.mubr.f32.mxu1 %v1033_v0  ;;  %306 = vmatprep.subr.mxu1 %v305_v21 }
  0x4a   : > { %312 = vmatpush1.msra.mxu1 %v311_v20 }
  0x4b   : > { %385 = vmatprep.subr.mxu1 %v302_v13 }
  0x4c   : > { %608 = vmatmul.mubr.f32.vlgmr.msra.gmra.mrb[0].mxu0 %v290_v7 }
  0x4d   : > { %617 = vmatpush1.msra.mxu0 %v225_v6  ;;  %680 = vmatprep.mubr.f32.mxu0 %v1033_v0 }
  0x50   : > { %377 = vmatmul.mubr.f32.vlgmr.msra.gmra.mrb[0].mxu1 %v290_v7 }
  0x51   : > { %388 = vmatpush1.msra.mxu1 %v308_v10  ;;  %451 = vmatprep.mubr.f32.mxu1 %v1033_v0 }
  0x54   : > { %682 = vmatmul.mubr.f32.vlgmr.msra.gmra.mrb[0].mxu0 %v290_v7 }
  0x58   : > { %454 = vmatmul.mubr.f32.vlgmr.msra.gmra.mrb[0].mxu1 %v291_v11 }
 0x127   : > { %v683_v22 = vpop.f32.mrb[0].mxu0 }
 0x128   : > { %v685_v23 = vpop.f32.mrb[1].mxu0 }
 0x12b   : > { %v455_v25 = vpop.f32.mrb[0].mxu1 }
 0x12c   : > { %v834_v26 = vadd.f32 %v455_v25, %v211_v24  ;;  %v457_v27 = vpop.f32.mrb[1].mxu1 }
 0x12d   : > { %v836_v28 = vadd.f32 %v457_v27, %v211_v24 }
 0x12e   : > { %v835_v29 = vadd.f32 %v834_v26, %v683_v22 }
 0x12f   : > { %v837_v30 = vadd.f32 %v836_v28, %v685_v23 }
 0x130   : > { %v825_v31 = vmul.f32 -1.442695, %v835_v29 }
 0x131   : > { %v826_v32 = vmul.f32 -1.442695, %v837_v30 }
 0x132   : > { %910 = vpow2.f32 %v825_v31 }
 0x133   : > { %912 = vpow2.f32 %v826_v32 }
 0x13c   : > { %v911_v33 = vpop.eup %910 }
 0x13d   : > { %v913_v34 = vpop.eup %912  ;;  %v694_v35 = vadd.f32 1.0, %v911_v33 }
 0x13e   : > { %v695_v36 = vadd.f32 1.0, %v913_v34 }
 0x13f   : > { %914 = vrcp.f32 %v694_v35 }
 0x140   : > { %916 = vrcp.f32 %v695_v36 }
 0x149   : > { %v915_v40 = vpop.eup %914 }
 0x14a   : > { %v917_v41 = vpop.eup %916  ;;  %v703_v42 = vrot.slane %v915_v40, %v702_v39 }
 0x14b   : > { %v707_v43 = vrot.slane %v917_v41, %v702_v39 }
 0x14d   : > { %v710_v44 = vcombine.low %v703_v42, %v707_v43 }
 0x14f   : > { %v712_v45 = vmul.f32 %v710_v44, %v1179_v1 }
 0x151   : > { %713 = vst [vmem:[%s205_s12] sm:$0xff] %v712_v45 }
 0x152   : > { %961 = shalt.err (!%p958_p6)
}
 0x153   : > { %s962_s4 = scalar_lea.hbm %s1194_s22, 128  ;;  %s966_s8 = scalar_lea.hbm %s1246_s3, 256 }
 0x154   : > { %p963_p4 = scmp.ne.s32.totalorder %s1194_s22, %s962_s4  ;;  %p967_p1 = scmp.lt.u32.totalorder %s1194_s22, %s1246_s3 }
 0x155   : > { %p968_p2 = scmp.lt.u32.totalorder %s966_s8, %s962_s4  ;;  %p970_p8 = scmp.lt.u32.totalorder %s962_s4, %s1194_s22 }
 0x156   : > { %p964_p10 = pnand %p963_p4, %p1255_p9 }
 0x157   : > { %p969_p5 = por %p968_p2, %p967_p1 }
 0x158   : > { %p965_p12 = pneg %p964_p10 }
 0x159   : > { %p971_p11 = por %p970_p8, %p969_p5 }
 0x15b   : > { %p972_p0 = pnand %p971_p11, %p965_p12 }
 0x15d   : > { %975 = shalt.err (!%p972_p0)
}
 0x15e   : > { %848 = dma.vmem_to_hbm [thread:$0]  (%p1255_p9), %s1196_s13, 128, %s1194_s22, %s715_s23  }
 0x15f PF: > { %s743_s9 = sand.u32 1, %s1010_s14   ;;  %p1256_p7 = scmp.ne.s32.totalorder %s1251_s28, 0 }
 0x160   : > { %p1257_p13 = scmp.ge.s32.totalorder %s1030_s19, 2  ;;  %s744_s25 = scalar_lea.sflag [#allocation5], %s743_s9 }
 0x162   : > { %p855_p3 = pnand %p1257_p13, %p1256_p7 }
 0x164   : > { %1005 = dma.done.wait (!%p855_p3), %s744_s25, 128  }
 0x165   : > { %1007 = vsyncadd (!%p855_p3), %s744_s25, 4294967168  ;;  %s20_s19 = sadd.s32 1, %s1030_s19   ;;  %s1258_s14 = smov %s1014_s15 }
 0x166   : > { %p17_p6 = scmp.ge.s32.totalorder %s20_s19, 4   ;;  %s1259_s15 = smov %s1018_s16 }
 0x167   : > { %s1260_s16 = smov %s1114_s27  ;;  %s1261_s17 = smov %s1026_s18 }
 0x168   : > { %s1262_s18 = smov %s1264_s21  ;;  %19 = sbr.rel (!%p17_p6) target bundleno = 8 (0x8), region = 77 }
 0x16f   :  { %749 = vsyncpa [#allocation4], 1 }
 0x170   :  { %751 = vsyncpa [#allocation4 + $0x1], 1 }
 0x171   :  { %752 = vsyncpa [#allocation5], 1 }
 0x172   :  { %754 = vsyncpa [#allocation5 + $0x1], 1 }

</bundles_post_ra>
